<compile_context>
chip_gen: v6e
topology: v6e:2x2x1
jax: 0.10.0
libtpu: 0.0.40
codegen_flags: <defaults>
</compile_context>

<pallas_src>
import jax
import jax.numpy as jnp
from jax.experimental import pallas as pl
from jax.experimental.pallas import tpu as pltpu

IN_FEATURES = 28 * 28   # 784
HIDDEN = 128
OUT_FEATURES = 10


def _round_up(n, m):
    return ((n + m - 1) // m) * m


def mlp_kernel(x_ref, w1_ref, b1_ref, w2_ref, b2_ref, o_ref):
    # Narrow x in-kernel (identity in the f32 path): x is read from HBM once,
    # in its original dtype, with no extra convert pass in the wrapper.
    x = x_ref[...].astype(w1_ref.dtype)
    # fc1 on the MXU, f32 accumulate; bias + ReLU in f32.
    h = jnp.dot(x, w1_ref[...], preferred_element_type=jnp.float32)
    h = jnp.maximum(h + b1_ref[...], 0.0)          # b1 is (1,128) f32, broadcasts
    # fc2: narrow h only for the MXU pass; accumulate f32, bias f32.
    o = jnp.dot(h.astype(w2_ref.dtype), w2_ref[...],
                preferred_element_type=jnp.float32)
    o_ref[...] = (o + b2_ref[...]).astype(o_ref.dtype)


def _choose_tb(B, tb_max):
    """Batch tile: multiple of 128, >=2 grid steps when B allows, capped at tb_max."""
    if B <= 128:
        return B                       # single block; full-dim block is legal
    tb = _round_up(pl.cdiv(B, 2), 128)
    return max(128, min(tb_max, tb))


def simple_model_forward(x, w1, b1, w2, b2, *,
                         compute_dtype=jnp.float32, tb_max=1024):
    """x: [B, 784] -> [B, 10] f32.  out = relu(x @ w1 + b1) @ w2 + b2."""
    B = x.shape[0]
    assert x.shape[1] == IN_FEATURES

    # Only the (tiny) weights are cast in the wrapper; x keeps its dtype so the
    # dominant HBM stream is read exactly once (no extra convert pass).
    w1_c = w1.astype(compute_dtype)
    w2_c = w2.astype(compute_dtype)

    TB = _choose_tb(B, tb_max)
    grid = (pl.cdiv(B, TB),)

    w_item = jnp.dtype(compute_dtype).itemsize
    cost = pl.CostEstimate(
        flops=2 * B * (IN_FEATURES * HIDDEN + HIDDEN * OUT_FEATURES),
        transcendentals=0,
        bytes_accessed=(B * IN_FEATURES * x.dtype.itemsize
                        + IN_FEATURES * HIDDEN * w_item
                        + HIDDEN * OUT_FEATURES * w_item
                        + HIDDEN * 4 + OUT_FEATURES * 4
                        + B * OUT_FEATURES * 4))

    return pl.pallas_call(
        mlp_kernel,
        out_shape=jax.ShapeDtypeStruct((B, OUT_FEATURES), jnp.float32),
        grid=grid,
        in_specs=[
            pl.BlockSpec((TB, IN_FEATURES), lambda i: (i, 0)),        # x tile
            pl.BlockSpec((IN_FEATURES, HIDDEN), lambda i: (0, 0)),    # w1 resident
            pl.BlockSpec((1, HIDDEN), lambda i: (0, 0)),              # b1 resident
            pl.BlockSpec((HIDDEN, OUT_FEATURES), lambda i: (0, 0)),   # w2 resident
            pl.BlockSpec((1, OUT_FEATURES), lambda i: (0, 0)),        # b2 resident
        ],
        out_specs=pl.BlockSpec((TB, OUT_FEATURES), lambda i: (i, 0)),
        compiler_params=pltpu.CompilerParams(
            dimension_semantics=("parallel",),
            vmem_limit_bytes=32 * 1024 * 1024),
        cost_estimate=cost,
    )(x, w1_c, b1, w2_c, b2)


def init_params(key):
    """Deterministic init matching nn.Linear shapes (weights stored transposed)."""
    k1, k2, k3, k4 = jax.random.split(key, 4)
    lim1 = 1.0 / (IN_FEATURES ** 0.5)
    lim2 = 1.0 / (HIDDEN ** 0.5)
    w1 = jax.random.uniform(k1, (IN_FEATURES, HIDDEN), jnp.float32, -lim1, lim1)
    b1 = jax.random.uniform(k2, (1, HIDDEN), jnp.float32, -lim1, lim1)
    w2 = jax.random.uniform(k3, (HIDDEN, OUT_FEATURES), jnp.float32, -lim2, lim2)
    b2 = jax.random.uniform(k4, (1, OUT_FEATURES), jnp.float32, -lim2, lim2)
    return w1, b1, w2, b2


if __name__ == "__main__":
    key = jax.random.PRNGKey(0)
    kx, kp, kx2 = jax.random.split(key, 3)

    w1, b1, w2, b2 = init_params(kp)

    def ref_fn(xx):
        return jnp.maximum(xx @ w1 + b1, 0.0) @ w2 + b2

    # Small batch (single full-dim block), f32 path: matches reference closely.
    B = 2
    x = jax.random.normal(kx, (B, IN_FEATURES), jnp.float32)
    out_f32 = jax.block_until_ready(simple_model_forward(x, w1, b1, w2, b2))
    assert out_f32.shape == (B, OUT_FEATURES)
    assert jnp.allclose(out_f32, ref_fn(x), atol=1e-4, rtol=1e-4)

    # bf16 compute path: weights narrowed in the wrapper, x narrowed in-kernel
    # (no extra HBM pass over x); looser tolerance.
    out_bf16 = jax.block_until_ready(
        simple_model_forward(x, w1, b1, w2, b2, compute_dtype=jnp.bfloat16))
    assert out_bf16.shape == (B, OUT_FEATURES)
    assert jnp.allclose(out_bf16, ref_fn(x), atol=5e-2, rtol=5e-2)

    # Non-divisible batch: exercises >=2 grid steps + masked partial last block
    # (no wrapper-side zero-padding of x).
    B2 = 300
    x2 = jax.random.normal(kx2, (B2, IN_FEATURES), jnp.float32)
    out2 = jax.block_until_ready(simple_model_forward(x2, w1, b1, w2, b2))
    assert out2.shape == (B2, OUT_FEATURES)
    assert jnp.allclose(out2, ref_fn(x2), atol=1e-4, rtol=1e-4)

    print("KERNEL_OK")
</pallas_src>

<mosaic_0001>
module attributes {stable_mosaic.version = 11 : i64} {
  func.func @mlp_kernel(%arg0: i32, %arg1: memref<2x784xf32, #tpu.memory_space<vmem>>, %arg2: memref<784x128xf32, #tpu.memory_space<vmem>>, %arg3: memref<1x128xf32, #tpu.memory_space<vmem>>, %arg4: memref<128x10xf32, #tpu.memory_space<vmem>>, %arg5: memref<1x10xf32, #tpu.memory_space<vmem>>, %arg6: memref<2x10xf32, #tpu.memory_space<vmem>>) attributes {dimension_semantics = [#tpu.dimension_semantics<parallel>], iteration_bounds = array<i64: 1>, scalar_prefetch = 0 : i64, scratch_operands = 0 : i64, tpu.core_type = #tpu.core_type<tc>, window_params = [{transform_indices = @transform_0, window_bounds = array<i64: 2, 784>}, {pipeline_mode = #tpu.pipeline_mode<synchronous>, transform_indices = @transform_1, window_bounds = array<i64: 784, 128>}, {pipeline_mode = #tpu.pipeline_mode<synchronous>, transform_indices = @transform_2, window_bounds = array<i64: 1, 128>}, {pipeline_mode = #tpu.pipeline_mode<synchronous>, transform_indices = @transform_3, window_bounds = array<i64: 128, 10>}, {pipeline_mode = #tpu.pipeline_mode<synchronous>, transform_indices = @transform_4, window_bounds = array<i64: 1, 10>}, {transform_indices = @transform_5, window_bounds = array<i64: 2, 10>}]} {
    %c0 = arith.constant 0 : index
    %c0_0 = arith.constant 0 : index
    %0 = vector.load %arg1[%c0, %c0_0] : memref<2x784xf32, #tpu.memory_space<vmem>>, vector<2x784xf32>
    %c0_1 = arith.constant 0 : index
    %c0_2 = arith.constant 0 : index
    %1 = vector.load %arg2[%c0_1, %c0_2] : memref<784x128xf32, #tpu.memory_space<vmem>>, vector<784x128xf32>
    %cst = arith.constant dense<0.000000e+00> : vector<2x128xf32>
    %2 = tpu.matmul %0, %1, %cst {dimension_numbers = #tpu.dot_dimension_numbers<[1], [0], [0], [1], [0, 0, 1, 1], [], []>} : vector<2x784xf32>, vector<784x128xf32>, vector<2x128xf32> -> vector<2x128xf32>
    %c0_3 = arith.constant 0 : index
    %c0_4 = arith.constant 0 : index
    %3 = vector.load %arg3[%c0_3, %c0_4] : memref<1x128xf32, #tpu.memory_space<vmem>>, vector<1x128xf32>
    %4 = vector.broadcast %3 : vector<1x128xf32> to vector<2x128xf32>
    %5 = arith.addf %2, %4 : vector<2x128xf32>
    %cst_5 = arith.constant 0.000000e+00 : f32
    %6 = vector.broadcast %cst_5 : f32 to vector<2x128xf32>
    %7 = arith.maximumf %5, %6 : vector<2x128xf32>
    %c0_6 = arith.constant 0 : index
    %c0_7 = arith.constant 0 : index
    %8 = vector.load %arg4[%c0_6, %c0_7] : memref<128x10xf32, #tpu.memory_space<vmem>>, vector<128x10xf32>
    %cst_8 = arith.constant dense<0.000000e+00> : vector<2x10xf32>
    %9 = tpu.matmul %7, %8, %cst_8 {dimension_numbers = #tpu.dot_dimension_numbers<[1], [0], [0], [1], [0, 0, 1, 1], [], []>} : vector<2x128xf32>, vector<128x10xf32>, vector<2x10xf32> -> vector<2x10xf32>
    %c0_9 = arith.constant 0 : index
    %c0_10 = arith.constant 0 : index
    %10 = vector.load %arg5[%c0_9, %c0_10] : memref<1x10xf32, #tpu.memory_space<vmem>>, vector<1x10xf32>
    %11 = vector.broadcast %10 : vector<1x10xf32> to vector<2x10xf32>
    %12 = arith.addf %9, %11 : vector<2x10xf32>
    %c0_11 = arith.constant 0 : index
    %c0_12 = arith.constant 0 : index
    %13 = vector.load %arg6[%c0_11, %c0_12] : memref<2x10xf32, #tpu.memory_space<vmem>>, vector<2x10xf32>
    tpu.vector_store %arg6[%c0_11, %c0_12], %12 {strides = array<i32>} : memref<2x10xf32, #tpu.memory_space<vmem>>, vector<2x10xf32>,
    return
  }
  func.func @transform_0(%arg0: i32) -> (i32, i32) {
    %c0_i32 = arith.constant 0 : i32
    %c0_i32_0 = arith.constant 0 : i32
    return %arg0, %c0_i32 : i32, i32
  }
  func.func @transform_1(%arg0: i32) -> (i32, i32) {
    %c0_i32 = arith.constant 0 : i32
    %c0_i32_0 = arith.constant 0 : i32
    %c0_i32_1 = arith.constant 0 : i32
    return %c0_i32, %c0_i32_0 : i32, i32
  }
  func.func @transform_2(%arg0: i32) -> (i32, i32) {
    %c0_i32 = arith.constant 0 : i32
    %c0_i32_0 = arith.constant 0 : i32
    %c0_i32_1 = arith.constant 0 : i32
    return %c0_i32, %c0_i32_0 : i32, i32
  }
  func.func @transform_3(%arg0: i32) -> (i32, i32) {
    %c0_i32 = arith.constant 0 : i32
    %c0_i32_0 = arith.constant 0 : i32
    %c0_i32_1 = arith.constant 0 : i32
    return %c0_i32, %c0_i32_0 : i32, i32
  }
  func.func @transform_4(%arg0: i32) -> (i32, i32) {
    %c0_i32 = arith.constant 0 : i32
    %c0_i32_0 = arith.constant 0 : i32
    %c0_i32_1 = arith.constant 0 : i32
    return %c0_i32, %c0_i32_0 : i32, i32
  }
  func.func @transform_5(%arg0: i32) -> (i32, i32) {
    %c0_i32 = arith.constant 0 : i32
    %c0_i32_0 = arith.constant 0 : i32
    return %arg0, %c0_i32 : i32, i32
  }
}

</mosaic_0001>

<bundles_post_ra>
// kernel: tpu_custom_call.1
= control target key start
LH: loop header
LB: loop body
LE: loop exit
PB: predicated region body
PF: predicated region fallthrough
CT: control target
= control target key end

     0   :  { %10 = vsyncpa [#allocation3], 0  ;;  %s934_s0 = inlined_call_operand.vmem [shape: f32[2,784], index: 0, kind: input, shape index: {}]   ;;  %s935_s1 = inlined_call_operand.hbm [shape: f32[784,128], index: 1, kind: input, shape index: {}]   ;;  %s936_s2 = inlined_call_operand.vmem [shape: f32[1,128], index: 2, kind: input, shape index: {}]   ;;  %s937_s3 = inlined_call_operand.vmem [shape: f32[128,10], index: 3, kind: input, shape index: {}]   ;;  %s938_s4 = inlined_call_operand.vmem [shape: f32[1,10], index: 4, kind: input, shape index: {}]   ;;  %s939_s5 = inlined_call_operand.hbm [shape: f32[2,10], index: 5, kind: output, shape index: {}]  }
   0x1   :  { %11 = vsyncpa [#allocation4], 0  ;;  %s800_s18 = smov [#allocation2]  }
   0x2   :  { %s19_s19 = sshll.u32 %s800_s18, 4  ;;  %s20_s19 = int_to_ptr.vmem [resolvable:$true] %s19_s19 }
   0x3   :  { %s764_s20 = scalar_lea.vmem %s20_s19, 12544  ;;  %p769_p1 = scmp.lt.s32.totalorder %s20_s19, %s20_s19 }
   0x4   :  { %p765_p0 = scmp.ne.s32.totalorder %s20_s19, %s764_s20  ;;  %p770_p2 = scmp.lt.s32.totalorder %s764_s20, %s764_s20 }
   0x6   :  { %p771_p3 = por %p770_p2, %p769_p1 }
   0x8   :  { %p772_p4 = pnand %p771_p3, %p765_p0 }
   0xa   :  { %775 = shalt.err (!%p772_p4)
}
   0xb   :  { %s801_s21 = smov 128   ;;  %s802_s22 = smov 8  }
   0xc   :  { %25 = dma.hbm_to_vmem [thread:$0]  %s935_s1, 12544, %s20_s19, [#allocation3], %s801_s21, %s801_s21, %s802_s22  }
   0xd   :  { %796 = dma.done.wait [#allocation3], 12544  }
   0xe   :  { %797 = vsyncadd [#allocation3], 4294954752  ;;  %v68_v0 = vld [vmem:[#allocation2 + $0xf8] sm:$0xff]  ;;  %v67_v2 = vld [vmem:[#allocation2 + $0xf0] sm:$0xff]  ;;  %v803_v27 = vmov 1983009808   ;;  %v148_v29 = vlaneseq }
   0xf   :  { %v52_v1 = vld [vmem:[#allocation2 + $0x78] sm:$0xff]  ;;  %580 = vmatprep.subr.mxu0 %v68_v0  ;;  %v51_v4 = vld [vmem:[#allocation2 + $0x70] sm:$0xff]  ;;  %v66_v6 = vld [vmem:[#allocation2 + $0xe8] sm:$0xff]  ;;  %v146_v28 = vunpack.c.l.s4 %v803_v27  ;;  %vm183_vm0 = vcmask 130048   ;;  %vm805_vm1 = vmmov 0   ;;  %s806_s10 = smov [#allocation5]  }
  0x10   :  { %v100_v3 = vld [vmem:[#allocation2 + $0x1f8] sm:$0xff]  ;;  %581 = vmatpush3.msra.mxu0 %v52_v1  ;;  %v99_v7 = vld [vmem:[#allocation2 + $0x1f0] sm:$0xff]  ;;  %v50_v8 = vld [vmem:[#allocation2 + $0x68] sm:$0xff]  ;;  %v149_v39 = vshrl.u32 %v148_v29, 7  ;;  %s568_s11 = sshll.u32 %s806_s10, 4  ;;  %vm560_vm2 = vcmask 74752   ;;  %s569_s11 = int_to_ptr.vmem [resolvable:$true] %s568_s11 }
  0x11   :  { %v84_v5 = vld [vmem:[#allocation2 + $0x178] sm:$0xff]  ;;  %615 = vmatprep.subr.mxu1 %v100_v3  ;;  %582 = vmatprep.subr.mxu0 %v67_v2  ;;  %v83_v9 = vld [vmem:[#allocation2 + $0x170] sm:$0xff]  ;;  %v98_v10 = vld [vmem:[#allocation2 + $0x1e8] sm:$0xff]  ;;  %v147_v38 = vunpack.c.0.s8 %v146_v28  ;;  %p781_p6 = scmp.lt.s32.totalorder %s569_s11, %s569_s11 }
  0x12   :  { %616 = vmatpush3.msra.mxu1 %v84_v5  ;;  %583 = vmatpush3.msra.mxu0 %v51_v4  ;;  %v65_v11 = vld [vmem:[#allocation2 + $0xe0] sm:$0xff]  ;;  %v82_v12 = vld [vmem:[#allocation2 + $0x168] sm:$0xff]  ;;  %v64_v15 = vld [vmem:[#allocation2 + $0xd8] sm:$0xff] }
  0x13   :  { %617 = vmatprep.subr.mxu1 %v99_v7  ;;  %584 = vmatprep.subr.mxu0 %v66_v6  ;;  %v49_v13 = vld [vmem:[#allocation2 + $0x60] sm:$0xff]  ;;  %v48_v17 = vld [vmem:[#allocation2 + $0x58] sm:$0xff]  ;;  %v63_v19 = vld [vmem:[#allocation2 + $0xd0] sm:$0xff]  ;;  %v840_v48 = vsub.s32 %v147_v38, %v149_v39 }
  0x14   :  { %618 = vmatpush3.msra.mxu1 %v83_v9  ;;  %v97_v14 = vld [vmem:[#allocation2 + $0x1e0] sm:$0xff]  ;;  %585 = vmatpush3.msra.mxu0 %v50_v8  ;;  %v96_v18 = vld [vmem:[#allocation2 + $0x1d8] sm:$0xff]  ;;  %v47_v21 = vld [vmem:[#allocation2 + $0x50] sm:$0xff] }
  0x15   :  { %619 = vmatprep.subr.mxu1 %v98_v10  ;;  %v81_v16 = vld [vmem:[#allocation2 + $0x160] sm:$0xff]  ;;  %586 = vmatprep.subr.mxu0 %v65_v11  ;;  %v80_v20 = vld [vmem:[#allocation2 + $0x158] sm:$0xff]  ;;  %v95_v22 = vld [vmem:[#allocation2 + $0x1d0] sm:$0xff] }
  0x16   :  { %620 = vmatpush3.msra.mxu1 %v82_v12  ;;  %587 = vmatpush3.msra.mxu0 %v49_v13  ;;  %v62_v23 = vld [vmem:[#allocation2 + $0xc8] sm:$0xff]  ;;  %v79_v24 = vld [vmem:[#allocation2 + $0x150] sm:$0xff]  ;;  %v61_v30 = vld [vmem:[#allocation2 + $0xc0] sm:$0xff] }
  0x17   :  { %621 = vmatprep.subr.mxu1 %v97_v14  ;;  %588 = vmatprep.subr.mxu0 %v64_v15  ;;  %v46_v25 = vld [vmem:[#allocation2 + $0x48] sm:$0xff]  ;;  %v45_v32 = vld [vmem:[#allocation2 + $0x40] sm:$0xff]  ;;  %v60_v34 = vld [vmem:[#allocation2 + $0xb8] sm:$0xff] }
  0x18   :  { %622 = vmatpush3.msra.mxu1 %v81_v16  ;;  %589 = vmatpush3.msra.mxu0 %v48_v17  ;;  %v94_v26 = vld [vmem:[#allocation2 + $0x1c8] sm:$0xff]  ;;  %v93_v33 = vld [vmem:[#allocation2 + $0x1c0] sm:$0xff]  ;;  %v44_v36 = vld [vmem:[#allocation2 + $0x38] sm:$0xff] }
  0x19   :  { %623 = vmatprep.subr.mxu1 %v96_v18  ;;  %590 = vmatprep.subr.mxu0 %v63_v19  ;;  %v78_v31 = vld [vmem:[#allocation2 + $0x148] sm:$0xff]  ;;  %v77_v35 = vld [vmem:[#allocation2 + $0x140] sm:$0xff]  ;;  %v92_v37 = vld [vmem:[#allocation2 + $0x1b8] sm:$0xff] }
  0x1a   :  { %624 = vmatpush3.msra.mxu1 %v80_v20  ;;  %591 = vmatpush3.msra.mxu0 %v47_v21  ;;  %v59_v40 = vld [vmem:[#allocation2 + $0xb0] sm:$0xff]  ;;  %v76_v41 = vld [vmem:[#allocation2 + $0x138] sm:$0xff]  ;;  %v58_v44 = vld [vmem:[#allocation2 + $0xa8] sm:$0xff] }
  0x1b   :  { %625 = vmatprep.subr.mxu1 %v95_v22  ;;  %592 = vmatprep.subr.mxu0 %v62_v23  ;;  %v43_v42 = vld [vmem:[#allocation2 + $0x30] sm:$0xff]  ;;  %v42_v46 = vld [vmem:[#allocation2 + $0x28] sm:$0xff]  ;;  %v57_v49 = vld [vmem:[#allocation2 + $0xa0] sm:$0xff] }
  0x1c   :  { %626 = vmatpush3.msra.mxu1 %v79_v24  ;;  %593 = vmatpush3.msra.mxu0 %v46_v25  ;;  %v91_v43 = vld [vmem:[#allocation2 + $0x1b0] sm:$0xff]  ;;  %v90_v47 = vld [vmem:[#allocation2 + $0x1a8] sm:$0xff]  ;;  %v35_v51 = vld [vmem:[%s934_s0] sm:$0xff]  ;;  %v804_v25 = vmov 0.0  }
  0x1d   :  { %627 = vmatprep.subr.mxu1 %v94_v26  ;;  %594 = vmatprep.subr.mxu0 %v61_v30  ;;  %v75_v45 = vld [vmem:[#allocation2 + $0x130] sm:$0xff]  ;;  %v74_v50 = vld [vmem:[#allocation2 + $0x128] sm:$0xff]  ;;  %v41_v52 = vld [vmem:[#allocation2 + $0x20] sm:$0xff]  ;;  %v151_v58 = vrot.slane %v35_v51, %v840_v48  ;;  %v144_v59 = vcombine.high %v35_v51, %v35_v51 }
  0x1e   :  { %628 = vmatpush3.msra.mxu1 %v78_v31  ;;  %595 = vmatpush3.msra.mxu0 %v45_v32  ;;  %v89_v53 = vld [vmem:[#allocation2 + $0x1a0] sm:$0xff]  ;;  %v56_v54 = vld [vmem:[#allocation2 + $0x98] sm:$0xff]  ;;  %v55_v60 = vld [vmem:[#allocation2 + $0x90] sm:$0xff] }
  0x1f   :  { %629 = vmatprep.subr.mxu1 %v93_v33  ;;  %596 = vmatprep.subr.mxu0 %v60_v34  ;;  %v73_v55 = vld [vmem:[#allocation2 + $0x120] sm:$0xff]  ;;  %v40_v56 = vld [vmem:[#allocation2 + $0x18] sm:$0xff]  ;;  %v39_v62 = vld [vmem:[#allocation2 + $0x10] sm:$0xff]  ;;  %v159_v4 = vcombine.high %v151_v58, %v151_v58  ;;  %v158_v5 = vrot.slane %v144_v59, %v840_v48 }
  0x20   :  { %630 = vmatpush3.msra.mxu1 %v77_v35  ;;  %597 = vmatpush3.msra.mxu0 %v44_v36  ;;  %v88_v57 = vld [vmem:[#allocation2 + $0x198] sm:$0xff]  ;;  %v87_v63 = vld [vmem:[#allocation2 + $0x190] sm:$0xff]  ;;  %v54_v0 = vld [vmem:[#allocation2 + $0x88] sm:$0xff] }
  0x21   :  { %631 = vmatprep.subr.mxu1 %v92_v37  ;;  %598 = vmatprep.subr.mxu0 %v59_v40  ;;  %v72_v61 = vld [vmem:[#allocation2 + $0x118] sm:$0xff]  ;;  %v71_v1 = vld [vmem:[#allocation2 + $0x110] sm:$0xff]  ;;  %v38_v2 = vld [vmem:[#allocation2 + $0x8] sm:$0xff]  ;;  %v160_v12 = vcombine.high %v158_v5, %v158_v5 }
  0x22   :  { %632 = vmatpush3.msra.mxu1 %v76_v41  ;;  %599 = vmatpush3.msra.mxu0 %v43_v42  ;;  %v86_v3 = vld [vmem:[#allocation2 + $0x188] sm:$0xff]  ;;  %v53_v6 = vld [vmem:[#allocation2 + $0x80] sm:$0xff]  ;;  %v132_v10 = vld [vmem:[#allocation2 + $0x2f8] sm:$0xff] }
  0x23   :  { %633 = vmatprep.subr.mxu1 %v91_v43  ;;  %600 = vmatprep.subr.mxu0 %v58_v44  ;;  %v37_v7 = vld [vmem:[#allocation2] sm:$0xff]  ;;  %v70_v8 = vld [vmem:[#allocation2 + $0x108] sm:$0xff]  ;;  %v116_v13 = vld [vmem:[#allocation2 + $0x278] sm:$0xff] }
  0x24   :  { %634 = vmatpush3.msra.mxu1 %v75_v45  ;;  %601 = vmatpush3.msra.mxu0 %v42_v46  ;;  %v85_v9 = vld [vmem:[#allocation2 + $0x180] sm:$0xff]  ;;  %v36_v14 = vld [vmem:[%s934_s0 + $0x8] sm:$0x3f]  ;;  %v131_v15 = vld [vmem:[#allocation2 + $0x2f0] sm:$0xff] }
  0x25   :  { %635 = vmatprep.subr.mxu1 %v90_v47  ;;  %602 = vmatprep.subr.mxu0 %v57_v49  ;;  %v69_v11 = vld [vmem:[#allocation2 + $0x100] sm:$0xff]  ;;  %v851_v16 = vrot.slane %v36_v14, %v840_v48  ;;  %v115_v17 = vld [vmem:[#allocation2 + $0x270] sm:$0xff]  ;;  %v130_v18 = vld [vmem:[#allocation2 + $0x2e8] sm:$0xff]  ;;  %v161_v19 = vcombine.high %v36_v14, %v36_v14 }
  0x26   :  { %636 = vmatpush3.msra.mxu1 %v74_v50  ;;  %603 = vmatpush3.msra.mxu0 %v41_v52  ;;  %v114_v21 = vld [vmem:[#allocation2 + $0x268] sm:$0xff]  ;;  %v129_v23 = vld [vmem:[#allocation2 + $0x2e0] sm:$0xff]  ;;  %v128_v27 = vld [vmem:[#allocation2 + $0x2d8] sm:$0xff] }
  0x27   :  { %637 = vmatprep.subr.mxu1 %v89_v53  ;;  %604 = vmatprep.subr.mxu0 %v56_v54  ;;  %v176_v20 = vcombine.high %v851_v16, %v851_v16  ;;  %v134_v22 = vld [vmem:[#allocation2 + $0x308] sm:$0xff]  ;;  %v113_v24 = vld [vmem:[#allocation2 + $0x260] sm:$0xff]  ;;  %v175_v28 = vrot.slane %v161_v19, %v840_v48  ;;  %v112_v29 = vld [vmem:[#allocation2 + $0x258] sm:$0xff] }
  0x28   :  { %638 = vmatpush3.msra.mxu1 %v73_v55  ;;  %605 = vmatpush3.msra.mxu0 %v40_v56  ;;  %v133_v26 = vld [vmem:[#allocation2 + $0x300] sm:$0xff]  ;;  %v127_v30 = vld [vmem:[#allocation2 + $0x2d0] sm:$0xff]  ;;  %v126_v32 = vld [vmem:[#allocation2 + $0x2c8] sm:$0xff] }
  0x29   :  { %639 = vmatprep.subr.mxu1 %v88_v57  ;;  %606 = vmatprep.subr.mxu0 %v55_v60  ;;  %v111_v31 = vld [vmem:[#allocation2 + $0x250] sm:$0xff]  ;;  %v110_v33 = vld [vmem:[#allocation2 + $0x248] sm:$0xff]  ;;  %v125_v34 = vld [vmem:[#allocation2 + $0x2c0] sm:$0xff] }
  0x2a   :  { %640 = vmatpush3.msra.mxu1 %v72_v61  ;;  %607 = vmatpush3.msra.mxu0 %v39_v62  ;;  %v109_v35 = vld [vmem:[#allocation2 + $0x240] sm:$0xff]  ;;  %v124_v36 = vld [vmem:[#allocation2 + $0x2b8] sm:$0xff]  ;;  %v123_v38 = vld [vmem:[#allocation2 + $0x2b0] sm:$0xff] }
  0x2b   :  { %641 = vmatprep.subr.mxu1 %v87_v63  ;;  %608 = vmatprep.subr.mxu0 %v54_v0  ;;  %v108_v37 = vld [vmem:[#allocation2 + $0x238] sm:$0xff]  ;;  %v107_v39 = vld [vmem:[#allocation2 + $0x230] sm:$0xff]  ;;  %v122_v40 = vld [vmem:[#allocation2 + $0x2a8] sm:$0xff] }
  0x2c   :  { %642 = vmatpush3.msra.mxu1 %v71_v1  ;;  %609 = vmatpush3.msra.mxu0 %v38_v2  ;;  %v106_v41 = vld [vmem:[#allocation2 + $0x228] sm:$0xff]  ;;  %v121_v42 = vld [vmem:[#allocation2 + $0x2a0] sm:$0xff]  ;;  %v120_v44 = vld [vmem:[#allocation2 + $0x298] sm:$0xff] }
  0x2d   :  { %643 = vmatprep.subr.mxu1 %v86_v3  ;;  %610 = vmatprep.subr.mxu0 %v53_v6  ;;  %v105_v43 = vld [vmem:[#allocation2 + $0x220] sm:$0xff]  ;;  %v104_v45 = vld [vmem:[#allocation2 + $0x218] sm:$0xff]  ;;  %v119_v46 = vld [vmem:[#allocation2 + $0x290] sm:$0xff] }
  0x2e   :  { %250 = vmatprep.mubr.f32.mxu0 %v159_v4  ;;  %611 = vmatpush3.msra.mxu0 %v37_v7  ;;  %v103_v47 = vld [vmem:[#allocation2 + $0x210] sm:$0xff]  ;;  %v118_v48 = vld [vmem:[#allocation2 + $0x288] sm:$0xff]  ;;  %v117_v50 = vld [vmem:[#allocation2 + $0x280] sm:$0xff] }
  0x2f   :  { %644 = vmatpush3.msra.mxu1 %v70_v8  ;;  %251 = vmatmul.mubr.f32.vlgmr.msra.gmra.mxu0 %v151_v58  ;;  %v102_v49 = vld [vmem:[#allocation2 + $0x208] sm:$0xff]  ;;  %v101_v51 = vld [vmem:[#allocation2 + $0x200] sm:$0xff]  ;;  %v482_v52 = vld [vmem:[%s937_s3 + $0x78] sm:$0xff] }
  0x30   :  { %645 = vmatprep.subr.mxu1 %v85_v9  ;;  %650 = vmatprep.subr.mxu0 %v132_v10  ;;  %v481_v53 = vld [vmem:[%s937_s3 + $0x70] sm:$0xff]  ;;  %v480_v54 = vld [vmem:[%s937_s3 + $0x68] sm:$0xff]  ;;  %v479_v55 = vld [vmem:[%s937_s3 + $0x60] sm:$0xff] }
  0x31   :  { %646 = vmatpush3.msra.mxu1 %v69_v11  ;;  %320 = vmatprep.mubr.f32.mxu1 %v160_v12  ;;  %v478_v56 = vld [vmem:[%s937_s3 + $0x58] sm:$0xff]  ;;  %v477_v57 = vld [vmem:[%s937_s3 + $0x50] sm:$0xff]  ;;  %v476_v58 = vld [vmem:[%s937_s3 + $0x48] sm:$0xff] }
  0x32   :  { %651 = vmatpush3.msra.mxu0 %v116_v13  ;;  %321 = vmatmul.mubr.f32.vlgmr.msra.gmra.mxu1 %v158_v5  ;;  %v475_v59 = vld [vmem:[%s937_s3 + $0x40] sm:$0xff]  ;;  %v474_v60 = vld [vmem:[%s937_s3 + $0x38] sm:$0xff]  ;;  %v473_v61 = vld [vmem:[%s937_s3 + $0x30] sm:$0xff] }
  0x33   :  { %652 = vmatprep.subr.mxu0 %v131_v15  ;;  %390 = vmatprep.mubr.f32.mxu0 %v176_v20  ;;  %v472_v62 = vld [vmem:[%s937_s3 + $0x28] sm:$0xff]  ;;  %v471_v63 = vld [vmem:[%s937_s3 + $0x20] sm:$0xff]  ;;  %v470_v0 = vld [vmem:[%s937_s3 + $0x18] sm:$0xff] }
  0x34   :  { %653 = vmatpush3.msra.mxu0 %v115_v17  ;;  %705 = vmatprep.subr.mxu1 %v804_v25  ;;  %v469_v1 = vld [vmem:[%s937_s3 + $0x10] sm:$0xff]  ;;  %v468_v2 = vld [vmem:[%s937_s3 + $0x8] sm:$0xff]  ;;  %v467_v3 = vld [vmem:[%s937_s3] sm:$0xff] }
  0x35   :  { %654 = vmatprep.subr.mxu0 %v130_v18  ;;  %706 = vmatpush3.msra.mxu1 %v134_v22  ;;  %v577_v11 = vld [vmem:[%s936_s2] ss:$0 sm:$0xff]  ;;  %s776_s2 = scalar_lea.vmem %s569_s11, 32 }
  0x36   :  { %655 = vmatpush3.msra.mxu0 %v114_v21  ;;  %707 = vmatprep.subr.mxu1 %v804_v25  ;;  %v579_v21 = vld [vmem:[%s938_s4] ss:$0 sm:$0xff]  ;;  %p777_p5 = scmp.ne.s32.totalorder %s569_s11, %s776_s2  ;;  %p782_p7 = scmp.lt.s32.totalorder %s776_s2, %s776_s2 }
  0x37   :  { %656 = vmatprep.subr.mxu0 %v129_v23  ;;  %708 = vmatpush3.msra.mxu1 %v133_v26 }
  0x38   :  { %657 = vmatpush3.msra.mxu0 %v113_v24  ;;  %709 = vmatprep.mubr.msk.f32.mxu1 %vm805_vm1, %v804_v25  ;;  %p783_p8 = por %p782_p7, %p781_p6 }
  0x39   :  { %658 = vmatprep.subr.mxu0 %v128_v27  ;;  %710 = vmatmul.mubr.msk.f32.vlgmr.msra.gmra.mxu1 %vm183_vm0, %v175_v28 }
  0x3a   :  { %659 = vmatpush3.msra.mxu0 %v112_v29  ;;  %712 = vmatprep.subr.mxu1 %v804_v25  ;;  %p784_p9 = pnand %p783_p8, %p777_p5 }
  0x3b   :  { %660 = vmatprep.subr.mxu0 %v127_v30  ;;  %744 = vmatprep.mubr.msk.f32.mxu1 %vm805_vm1, %v804_v25 }
  0x3c   :  { %661 = vmatpush3.msra.mxu0 %v111_v31  ;;  %713 = vmatpush3.msra.mxu1 %v482_v52 }
  0x3d   :  { %662 = vmatprep.subr.mxu0 %v126_v32  ;;  %714 = vmatprep.subr.mxu1 %v804_v25 }
  0x3e   :  { %663 = vmatpush3.msra.mxu0 %v110_v33  ;;  %715 = vmatpush3.msra.mxu1 %v481_v53 }
  0x3f   :  { %664 = vmatprep.subr.mxu0 %v125_v34  ;;  %716 = vmatprep.subr.mxu1 %v804_v25 }
  0x40   :  { %665 = vmatpush3.msra.mxu0 %v109_v35  ;;  %717 = vmatpush3.msra.mxu1 %v480_v54 }
  0x41   :  { %666 = vmatprep.subr.mxu0 %v124_v36  ;;  %718 = vmatprep.subr.mxu1 %v804_v25 }
  0x42   :  { %667 = vmatpush3.msra.mxu0 %v108_v37  ;;  %719 = vmatpush3.msra.mxu1 %v479_v55 }
  0x43   :  { %668 = vmatprep.subr.mxu0 %v123_v38  ;;  %720 = vmatprep.subr.mxu1 %v804_v25 }
  0x44   :  { %669 = vmatpush3.msra.mxu0 %v107_v39  ;;  %721 = vmatpush3.msra.mxu1 %v478_v56 }
  0x45   :  { %670 = vmatprep.subr.mxu0 %v122_v40  ;;  %722 = vmatprep.subr.mxu1 %v804_v25 }
  0x46   :  { %671 = vmatpush3.msra.mxu0 %v106_v41  ;;  %723 = vmatpush3.msra.mxu1 %v477_v57 }
  0x47   :  { %672 = vmatprep.subr.mxu0 %v121_v42  ;;  %724 = vmatprep.subr.mxu1 %v804_v25 }
  0x48   :  { %673 = vmatpush3.msra.mxu0 %v105_v43  ;;  %725 = vmatpush3.msra.mxu1 %v476_v58 }
  0x49   :  { %674 = vmatprep.subr.mxu0 %v120_v44  ;;  %726 = vmatprep.subr.mxu1 %v804_v25 }
  0x4a   :  { %675 = vmatpush3.msra.mxu0 %v104_v45  ;;  %727 = vmatpush3.msra.mxu1 %v475_v59 }
  0x4b   :  { %676 = vmatprep.subr.mxu0 %v119_v46  ;;  %728 = vmatprep.subr.mxu1 %v804_v25 }
  0x4c   :  { %677 = vmatpush3.msra.mxu0 %v103_v47  ;;  %729 = vmatpush3.msra.mxu1 %v474_v60 }
  0x4d   :  { %678 = vmatprep.subr.mxu0 %v118_v48  ;;  %730 = vmatprep.subr.mxu1 %v804_v25 }
  0x4e   :  { %679 = vmatpush3.msra.mxu0 %v102_v49  ;;  %731 = vmatpush3.msra.mxu1 %v473_v61 }
  0x4f   :  { %680 = vmatprep.subr.mxu0 %v117_v50  ;;  %732 = vmatprep.subr.mxu1 %v804_v25 }
  0x50   :  { %681 = vmatpush3.msra.mxu0 %v101_v51  ;;  %733 = vmatpush3.msra.mxu1 %v472_v62 }
  0x51   :  { %391 = vmatmul.mubr.f32.vlgmr.msra.gmra.mxu0 %v851_v16  ;;  %734 = vmatprep.subr.mxu1 %v804_v25 }
  0x52   :  { %735 = vmatpush3.msra.mxu1 %v471_v63 }
  0x53   :  { %736 = vmatprep.subr.mxu1 %v804_v25 }
  0x54   :  { %737 = vmatpush3.msra.mxu1 %v470_v0 }
  0x55   :  { %738 = vmatprep.subr.mxu1 %v804_v25 }
  0x56   :  { %739 = vmatpush3.msra.mxu1 %v469_v1 }
  0x57   :  { %740 = vmatprep.subr.mxu1 %v804_v25 }
  0x58   :  { %741 = vmatpush3.msra.mxu1 %v468_v2 }
  0x59   :  { %742 = vmatprep.subr.mxu1 %v804_v25 }
  0x5a   :  { %743 = vmatpush3.msra.mxu1 %v467_v3 }
  0xef   :  { %v612_v8 = vpop.f32.mrf.mxu0 }
  0xf1   :  { %v613_v9 = vpop.f32.mrf.mxu0 }
  0xf2   :  { %v647_v4 = vpop.f32.mrf.mxu1  ;;  %v614_v10 = vadd.f32 %v613_v9, %v612_v8 }
  0xf4   :  { %v648_v5 = vpop.f32.mrf.mxu1  ;;  %v253_v12 = vadd.f32 %v614_v10, %v577_v11 }
  0xf5   :  { %v649_v13 = vadd.f32 %v648_v5, %v647_v4 }
  0xf7   :  { %v323_v16 = vadd.f32 %v649_v13, %v253_v12 }
  0xf9   :  { %v462_v6 = vpop.f32.mrf.mxu1 }
  0xfb   :  { %v711_v7 = vpop.f32.mrf.mxu1 }
 0x111   :  { %v682_v14 = vpop.f32.mrf.mxu0 }
 0x113   :  { %v683_v15 = vpop.f32.mrf.mxu0 }
 0x114   :  { %v684_v17 = vadd.f32 %v683_v15, %v682_v14 }
 0x116   :  { %v393_v18 = vadd.f32 %v684_v17, %v323_v16 }
 0x118   :  { %v463_v19 = vadd.f32 %v462_v6, %v393_v18 }
 0x11a   :  { %v466_v20 = vmax.f32 %v463_v19, 0.0 }
 0x11c   :  { %745 = vmatmul.mubr.f32.vlgmr.msra.gmra.mxu1 %v466_v20 }
 0x1dc   :  { %v556_v22 = vpop.f32.mrf.mxu1 }
 0x1dd   :  { %v557_v23 = vadd.f32 %v579_v21, %v556_v22 }
 0x1de   :  { %v746_v24 = vpop.f32.mrf.mxu1 }
 0x1df   :  { %561 = vst.msk [vmem:[#allocation5] sm:$0x3] %vm560_vm2, %v557_v23 }
 0x1e0   :  { %787 = shalt.err (!%p784_p9)
}
 0x1e1   :  { %571 = dma.vmem_to_hbm [thread:$0]  %s569_s11, 32, %s939_s5, [#allocation4]  }
 0x1e2   :  { %798 = dma.done.wait [#allocation4], 32  }
 0x1e3   :  { %799 = vsyncadd [#allocation4], 4294967264 }
 0x1e4   :  { %575 = vsyncpa [#allocation3], 1 }
 0x1e5   :  { %576 = vsyncpa [#allocation4], 1 }

</bundles_post_ra>
